<compile_context>
chip_gen: v7x
topology: tpu7x:2x2x1
jax: 0.10.0
libtpu: 0.0.40
codegen_flags: <defaults>
</compile_context>

<pallas_src>
import functools

import jax
import jax.numpy as jnp
from jax import lax
from jax.experimental import pallas as pl
from jax.experimental.pallas import tpu as pltpu


def _deconv_kernel(x_ref, w_ref, b_ref, o_ref, *, th, W, Cout,
                   compute_dtype, per_row_store):
    """One (batch, row-tile) step of the k=2 / s=2 transposed conv.

    x_ref: (1, Cin, th*W)         NCHW input rows, channels on sublanes.
    w_ref: (Cin, 4*Cout)          w[ci, kh*2*Cout + kw*Cout + co] = W[ci,co,kh,kw].
    b_ref: (1, 4*Cout)            bias tiled over (kh, kw), f32.
    o_ref: (1, th, 2, W, 2*Cout)  NHWC output rows: (h, kh, w, (kw, co)).
    """
    x = x_ref[0]                                # (Cin, th*W)
    if compute_dtype is not None:
        x = x.astype(compute_dtype)             # narrow BEFORE any layout change
    # Single fused matmul covering both kh: contract Cin (dim 0 of BOTH
    # operands) -> no materialized XLU transpose of the activations.
    z = lax.dot_general(
        x, w_ref[...],
        dimension_numbers=(((0,), (0,)), ((), ())),
        preferred_element_type=jnp.float32)     # (th*W, 4*Cout), f32 acc
    z = (z + b_ref[...]).astype(o_ref.dtype)
    for kh in range(2):
        zk = z[:, kh * 2 * Cout:(kh + 1) * 2 * Cout]   # static lane slice
        if per_row_store:
            # W % 8 != 0: the (th*W, C) -> (th, W, C) split is not
            # layout-free; fall back to per-row stores (correct, slower).
            for h in range(th):
                o_ref[0, h, kh, :, :] = zk[h * W:(h + 1) * W, :]
        else:
            # One store per kh; layout-preserving because W % 8 == 0.
            o_ref[0, :, kh, :, :] = zk.reshape(th, W, 2 * Cout)


def _vmem_capacity_bytes():
    try:
        info = pltpu.get_tpu_info()
        cap = getattr(info, "vmem_capacity_bytes", None)
        if cap:
            return int(cap)
    except Exception:
        pass
    return 128 * 1024 * 1024          # conservative fallback (v5e/v6e)


def _pick_row_tile(N, H, W, footprint, budget_bytes):
    """Largest divisor of H whose double-buffered footprint fits the budget.

    Legal tiles keep the input block's lane dim (th*W) either equal to the
    full H*W or a multiple of 128 (Mosaic (8,128) block constraint).
    """
    legal = [t for t in range(1, H + 1)
             if H % t == 0 and (t == H or (t * W) % 128 == 0)]
    fits = [t for t in legal if footprint(t) <= budget_bytes]
    if not fits:
        # Smallest legal tile; vmem_limit_bytes is derived from footprint(th)
        # so the compiler limit stays consistent with the choice.
        return min(legal)
    th = max(fits)
    # v7x has 2 TensorCores per chip: with N == 1 keep >=2 parallel grid steps
    # so the second core (and its HBM pull) is not idle.  Near-zero cost on
    # single-core chips.
    if N == 1 and H // th < 2:
        smaller = [t for t in fits if H // t >= 2]
        if smaller:
            th = max(smaller)
    return th


def conv_transpose_2x2_stride2(x_nchw, weight, bias, *, out_format="NHWC",
                               out_dtype=None, compute_dtype=None,
                               vmem_budget_bytes=None):
    """Equivalent of nn.ConvTranspose2d(Cin, Cout, 2, stride=2)(x_nchw).

    x_nchw : (N, Cin, H, W)
    weight : (Cin, Cout, 2, 2)   (PyTorch ConvTranspose2d layout)
    bias   : (Cout,)
    out_format   : "NHWC" (default, TPU-native, zero extra HBM passes) or
                   "NCHW" (strict PyTorch parity, one extra full layout pass).
    out_dtype    : output dtype (e.g. jnp.bfloat16) — output bytes dominate
                   HBM traffic ~4:1, accumulation stays f32.
    compute_dtype: e.g. jnp.bfloat16 for the deep 256/512-channel layers.
    """
    N, Cin, H, W = x_nchw.shape
    Cout = weight.shape[1]
    out_dtype = x_nchw.dtype if out_dtype is None else jnp.dtype(out_dtype)

    # Tiny parameter re-layouts (weights/bias only, negligible HBM traffic).
    # w4[ci, kh*2*Cout + kw*Cout + co] = weight[ci, co, kh, kw]
    w4 = jnp.transpose(weight, (0, 2, 3, 1)).reshape(Cin, 4 * Cout)
    if compute_dtype is not None:
        w4 = w4.astype(compute_dtype)
    b4 = jnp.tile(bias.astype(jnp.float32), 4).reshape(1, 4 * Cout)

    # Free reshape: the NCHW input is consumed directly, no HBM transpose.
    x3 = x_nchw.reshape(N, Cin, H * W)

    x_item = jnp.dtype(x3.dtype).itemsize
    o_item = jnp.dtype(out_dtype).itemsize
    w_item = jnp.dtype(w4.dtype).itemsize

    capacity = _vmem_capacity_bytes()
    if vmem_budget_bytes is None:
        # ~48 MiB on v5e/v6e (128 MiB physical), ~48 MiB cap on v7x (64 MiB).
        vmem_budget_bytes = min(48 * 1024 * 1024, capacity * 3 // 4)

    # Weights + bias, conservatively counted double-buffered.
    const_bytes = 2 * (Cin * 4 * Cout * w_item + 4 * Cout * 4)

    def footprint(t):
        return const_bytes + 2 * (Cin * t * W * x_item
                                  + t * 2 * W * 2 * Cout * o_item)

    th = _pick_row_tile(N, H, W, footprint, vmem_budget_bytes)
    grid = (N, H // th)

    # Compiler VMEM limit derived from the actual tile footprint (+ headroom),
    # capped at the chip's physical capacity.
    vmem_limit = int(min(capacity,
                         max(32 * 1024 * 1024,
                             footprint(th) * 5 // 4 + 4 * 1024 * 1024)))

    flops = 2 * N * H * W * Cin * 4 * Cout
    bytes_accessed = (x3.size * x_item + w4.size * w_item + b4.size * 4
                      + N * H * 2 * W * 2 * Cout * o_item)

    out5 = pl.pallas_call(
        functools.partial(_deconv_kernel, th=th, W=W, Cout=Cout,
                          compute_dtype=compute_dtype,
                          per_row_store=(W % 8 != 0)),
        out_shape=jax.ShapeDtypeStruct((N, H, 2, W, 2 * Cout), out_dtype),
        grid_spec=pltpu.PrefetchScalarGridSpec(
            num_scalar_prefetch=0,
            grid=grid,
            in_specs=[
                pl.BlockSpec((1, Cin, th * W), lambda n, i: (n, 0, i)),
                pl.BlockSpec((Cin, 4 * Cout), lambda n, i: (0, 0)),
                pl.BlockSpec((1, 4 * Cout), lambda n, i: (0, 0)),
            ],
            out_specs=pl.BlockSpec((1, th, 2, W, 2 * Cout),
                                   lambda n, i: (n, i, 0, 0, 0)),
        ),
        compiler_params=pltpu.CompilerParams(
            dimension_semantics=("parallel", "parallel"),
            vmem_limit_bytes=vmem_limit,
        ),
        cost_estimate=pl.CostEstimate(flops=flops, transcendentals=0,
                                      bytes_accessed=bytes_accessed),
    )(x3, w4, b4)

    # (N, H, 2, W, 2*Cout) -> (N, 2H, 2W, Cout): identical linear order, free.
    out_nhwc = out5.reshape(N, 2 * H, 2 * W, Cout)
    if out_format == "NHWC":
        return out_nhwc
    # One full extra HBM pass — only for strict PyTorch (NCHW) layout parity.
    return jnp.transpose(out_nhwc, (0, 3, 1, 2))


def _reference_nchw(x_nchw, weight, bias):
    # Pure-jnp reference for ConvTranspose2d(k=2, s=2), NCHW.
    N, Cin, H, W = x_nchw.shape
    Cout = weight.shape[1]
    o = jnp.einsum("nchw,cokl->nohkwl", x_nchw, weight)
    o = o.reshape(N, Cout, 2 * H, 2 * W)
    return o + bias[None, :, None, None]


if __name__ == "__main__":
    key = jax.random.PRNGKey(0)

    # (N, C, H, W, compute_dtype, out_dtype, tolerance)
    cases = [
        (2, 4, 16, 16, None, None, 1e-4),                    # tiny smoke test
        (2, 64, 8, 8, None, None, 1e-4),                     # shallow real `up`
        (2, 64, 8, 8, jnp.bfloat16, jnp.bfloat16, 5e-2),     # bf16 compute+output
    ]
    for idx, (n, c, h, w, cdt, odt, tol) in enumerate(cases):
        k_x, k_w, k_b = jax.random.split(jax.random.fold_in(key, idx), 3)
        x = jax.random.normal(k_x, (n, c, h, w), dtype=jnp.float32)
        weight = jax.random.normal(k_w, (c, c, 2, 2), dtype=jnp.float32) * 0.1
        bias = jax.random.normal(k_b, (c,), dtype=jnp.float32) * 0.1

        ref = _reference_nchw(x, weight, bias)

        # Default NHWC output (TPU-native, no extra HBM layout pass).
        out_nhwc = conv_transpose_2x2_stride2(x, weight, bias,
                                              compute_dtype=cdt, out_dtype=odt)
        out_nhwc = jax.block_until_ready(out_nhwc)
        assert out_nhwc.shape == (n, 2 * h, 2 * w, c), out_nhwc.shape
        got = jnp.transpose(out_nhwc.astype(jnp.float32), (0, 3, 1, 2))
        assert jnp.allclose(got, ref, atol=tol, rtol=tol), \
            f"NHWC mismatch, case {idx}"

        # Optional strict PyTorch (NCHW) layout parity.
        out_nchw = conv_transpose_2x2_stride2(x, weight, bias,
                                              out_format="NCHW",
                                              compute_dtype=cdt, out_dtype=odt)
        out_nchw = jax.block_until_ready(out_nchw)
        assert out_nchw.shape == (n, c, 2 * h, 2 * w), out_nchw.shape
        assert jnp.allclose(out_nchw.astype(jnp.float32), ref,
                            atol=tol, rtol=tol), f"NCHW mismatch, case {idx}"

    print("KERNEL_OK")
</pallas_src>

<mosaic_0001>
module attributes {stable_mosaic.version = 11 : i64} {
  func.func @_deconv_kernel(%arg0: i32, %arg1: i32, %arg2: memref<1x4x256xf32, #tpu.memory_space<vmem>>, %arg3: memref<4x16xf32, #tpu.memory_space<vmem>>, %arg4: memref<1x16xf32, #tpu.memory_space<vmem>>, %arg5: memref<1x16x2x16x8xf32, #tpu.memory_space<vmem>>) attributes {dimension_semantics = [#tpu.dimension_semantics<parallel>, #tpu.dimension_semantics<parallel>], iteration_bounds = array<i64: 2, 1>, scalar_prefetch = 0 : i64, scratch_operands = 0 : i64, tpu.core_type = #tpu.core_type<tc>, window_params = [{transform_indices = @transform_0, window_bounds = array<i64: 1, 4, 256>}, {pipeline_mode = #tpu.pipeline_mode<synchronous>, transform_indices = @transform_1, window_bounds = array<i64: 4, 16>}, {pipeline_mode = #tpu.pipeline_mode<synchronous>, transform_indices = @transform_2, window_bounds = array<i64: 1, 16>}, {transform_indices = @transform_3, window_bounds = array<i64: 1, 16, 2, 16, 8>}]} {
    %c0 = arith.constant 0 : index
    %c0_0 = arith.constant 0 : index
    %c0_1 = arith.constant 0 : index
    %0 = vector.load %arg2[%c0, %c0_0, %c0_1] : memref<1x4x256xf32, #tpu.memory_space<vmem>>, vector<1x4x256xf32>
    %1 = vector.shape_cast %0 : vector<1x4x256xf32> to vector<4x256xf32>
    %c0_2 = arith.constant 0 : index
    %c0_3 = arith.constant 0 : index
    %2 = vector.load %arg3[%c0_2, %c0_3] : memref<4x16xf32, #tpu.memory_space<vmem>>, vector<4x16xf32>
    %cst = arith.constant dense<0.000000e+00> : vector<256x16xf32>
    %3 = tpu.matmul %1, %2, %cst {dimension_numbers = #tpu.dot_dimension_numbers<[0], [0], [1], [1], [0, 1, 1, 1], [], []>} : vector<4x256xf32>, vector<4x16xf32>, vector<256x16xf32> -> vector<256x16xf32>
    %c0_4 = arith.constant 0 : index
    %c0_5 = arith.constant 0 : index
    %4 = vector.load %arg4[%c0_4, %c0_5] : memref<1x16xf32, #tpu.memory_space<vmem>>, vector<1x16xf32>
    %5 = vector.broadcast %4 : vector<1x16xf32> to vector<256x16xf32>
    %6 = arith.addf %3, %5 : vector<256x16xf32>
    %7 = vector.extract_strided_slice %6 {offsets = [0, 0], sizes = [256, 8], strides = [1, 1]} : vector<256x16xf32> to vector<256x8xf32>
    %8 = vector.shape_cast %7 : vector<256x8xf32> to vector<16x16x8xf32>
    %c0_6 = arith.constant 0 : index
    %c0_7 = arith.constant 0 : index
    %c0_8 = arith.constant 0 : index
    %c0_9 = arith.constant 0 : index
    %c0_10 = arith.constant 0 : index
    %9 = vector.load %arg5[%c0_6, %c0_7, %c0_8, %c0_9, %c0_10] : memref<1x16x2x16x8xf32, #tpu.memory_space<vmem>>, vector<1x16x1x16x8xf32>
    %10 = vector.shape_cast %9 : vector<1x16x1x16x8xf32> to vector<16x16x8xf32>
    %11 = vector.shape_cast %8 : vector<16x16x8xf32> to vector<1x16x1x16x8xf32>
    tpu.vector_store %arg5[%c0_6, %c0_7, %c0_8, %c0_9, %c0_10], %11 {strides = array<i32>} : memref<1x16x2x16x8xf32, #tpu.memory_space<vmem>>, vector<1x16x1x16x8xf32>,
    %12 = vector.extract_strided_slice %6 {offsets = [0, 8], sizes = [256, 8], strides = [1, 1]} : vector<256x16xf32> to vector<256x8xf32>
    %13 = vector.shape_cast %12 : vector<256x8xf32> to vector<16x16x8xf32>
    %c0_11 = arith.constant 0 : index
    %c0_12 = arith.constant 0 : index
    %c1 = arith.constant 1 : index
    %c0_13 = arith.constant 0 : index
    %c0_14 = arith.constant 0 : index
    %14 = vector.load %arg5[%c0_11, %c0_12, %c1, %c0_13, %c0_14] : memref<1x16x2x16x8xf32, #tpu.memory_space<vmem>>, vector<1x16x1x16x8xf32>
    %15 = vector.shape_cast %14 : vector<1x16x1x16x8xf32> to vector<16x16x8xf32>
    %16 = vector.shape_cast %13 : vector<16x16x8xf32> to vector<1x16x1x16x8xf32>
    tpu.vector_store %arg5[%c0_11, %c0_12, %c1, %c0_13, %c0_14], %16 {strides = array<i32>} : memref<1x16x2x16x8xf32, #tpu.memory_space<vmem>>, vector<1x16x1x16x8xf32>,
    return
  }
  func.func @transform_0(%arg0: i32, %arg1: i32) -> (i32, i32, i32) {
    %c0_i32 = arith.constant 0 : i32
    %c0_i32_0 = arith.constant 0 : i32
    return %arg0, %c0_i32, %arg1 : i32, i32, i32
  }
  func.func @transform_1(%arg0: i32, %arg1: i32) -> (i32, i32) {
    %c0_i32 = arith.constant 0 : i32
    %c0_i32_0 = arith.constant 0 : i32
    %c0_i32_1 = arith.constant 0 : i32
    return %c0_i32, %c0_i32_0 : i32, i32
  }
  func.func @transform_2(%arg0: i32, %arg1: i32) -> (i32, i32) {
    %c0_i32 = arith.constant 0 : i32
    %c0_i32_0 = arith.constant 0 : i32
    %c0_i32_1 = arith.constant 0 : i32
    return %c0_i32, %c0_i32_0 : i32, i32
  }
  func.func @transform_3(%arg0: i32, %arg1: i32) -> (i32, i32, i32, i32, i32) {
    %c0_i32 = arith.constant 0 : i32
    %c0_i32_0 = arith.constant 0 : i32
    %c0_i32_1 = arith.constant 0 : i32
    %c0_i32_2 = arith.constant 0 : i32
    return %arg0, %arg1, %c0_i32, %c0_i32_0, %c0_i32_1 : i32, i32, i32, i32, i32
  }
}

</mosaic_0001>

<bundles_post_ra>
// kernel: tpu_custom_call.1
= control target key start
LH: loop header
LB: loop body
LE: loop exit
PB: predicated region body
PF: predicated region fallthrough
CT: control target
= control target key end

     0   :  { %8 = vsyncpa [#allocation3], 0  ;;  %s1751_s0 = inlined_call_operand.hbm [shape: f32[2,4,256], index: 0, kind: input, shape index: {}]   ;;  %s1752_s1 = inlined_call_operand.hbm [shape: f32[4,16], index: 1, kind: input, shape index: {}]   ;;  %s1753_s2 = inlined_call_operand.vmem [shape: f32[1,16], index: 2, kind: input, shape index: {}]   ;;  %s1754_s3 = inlined_call_operand.vmem [shape: f32[2,16,2,16,8], index: 3, kind: output, shape index: {}]  }
   0x1   :  { %10 = vsyncpa [#allocation3 + $0x1], 0 }
   0x2   :  { %11 = vsyncpa [#allocation5], 0  ;;  %s1313_s12 = smov 0   ;;  %s1315_s13 = smov 0  }
   0x3   :  { %s1317_s14 = smov 0   ;;  %s1319_s15 = smov 0  }
   0x4   :  { %s1321_s16 = smov 0   ;;  %s1323_s17 = smov 0  }
   0x5 LB: > { %s939_s18 = sadd.s32 4294967295, %s1288_s17   ;;  %p51_p0 = scmp.ne.s32.totalorder %s1272_s13, %s1268_s12  ;;  %s1288_s17 = sphi %s1323_s17, %s17_s17   ;;  %s1284_s16 = sphi %s1321_s16, %s1773_s16   ;;  %s1280_s15 = sphi %s1319_s15, %s1772_s15   ;;  %s1276_s14 = sphi %s1317_s14, %s1771_s14   ;;  %s1272_s13 = sphi %s1315_s13, %s1770_s13   ;;  %s1268_s12 = sphi %s1313_s12, %s1769_s12  }
   0x6   : > { %p1343_p1 = scmp.eq.s32.totalorder %s939_s18, 0  ;;  %p941_p2 = scmp.ge.s32.totalorder %s1288_s17, 1 }
   0x7   : > { %p132_p3 = scmp.lt.s32.totalorder %s1288_s17, 3  ;;  %s1290_s22 = smov [#allocation4]  }
   0x8   : > { %s1759_s19 = scalar_select %p1343_p1, 1, 0 }
   0x9   : > { %p1351_p4 = por %p1343_p1, %p51_p0  ;;  %p1355_p5 = pnand %p941_p2, %p132_p3 }
   0xa   : > { %s145_s23 = sshll.u32 %s1290_s22, 4  ;;  %s29_s25 = sadd.s32 1, %s1284_s16  ;;  %s146_s23 = int_to_ptr.vmem [resolvable:$true] %s145_s23 }
   0xb   : > { %s1760_s20 = scalar_select %p1351_p4, 1, 0 }
   0xc   : > { %s1761_s21 = scalar_select %p1355_p5, 1, 0 }
   0xd   : > { %p1113_p6 = pneg %p1355_p5  ;;  %s38_s26 = sadd.s32 1, %s1276_s14 }
   0xe   : > { %p1369_p8 = scmp.ge.s32.totalorder %s29_s25, 2  ;;  %s1176_s30 = scalar_lea.hbm %s1752_s1, 64 }
   0xf   : > { %p1363_p7 = pnand %p1113_p6, %p1343_p1  ;;  %p1177_p9 = scmp.ne.s32.totalorder %s1752_s1, %s1176_s30 }
  0x10   : > { %s1763_s27 = scalar_select %p1369_p8, 1, 0 }
  0x11   : > { %p1178_p10 = pneg %p1363_p7  ;;  %p1183_p13 = scmp.lt.u32.totalorder %s1176_s30, %s1752_s1 }
  0x13   : > { %p1179_p11 = pnand %p1178_p10, %p1177_p9 }
  0x15   : > { %p1180_p12 = pneg %p1179_p11 }
  0x17   : > { %p1185_p0 = pnand %p1183_p13, %p1180_p12 }
  0x19   : > { %1188 = shalt.err (!%p1185_p0)
}
  0x1a   : > { %s1189_s8 = scalar_lea.vmem %s146_s23, 64  ;;  %p1197_p1 = scmp.lt.s32.totalorder %s146_s23, %s146_s23 }
  0x1b   : > { %p1190_p2 = scmp.ne.s32.totalorder %s146_s23, %s1189_s8  ;;  %p1198_p4 = scmp.lt.s32.totalorder %s1189_s8, %s1189_s8 }
  0x1d   : > { %p1192_p3 = pnand %p1190_p2, %p1178_p10  ;;  %p1199_p5 = por %p1198_p4, %p1197_p1 }
  0x1f   : > { %p1193_p6 = pneg %p1192_p3 }
  0x21   : > { %p1200_p8 = pnand %p1199_p5, %p1193_p6 }
  0x23   : > { %1203 = shalt.err (!%p1200_p8)
}
  0x24   : > { %1116 = dma.hbm_to_vmem [thread:$0]  (!%p1363_p7), %s1752_s1, 64, %s146_s23, [#allocation5]  }
  0x25   : > { %p1764_p9 = scmp.ne.s32.totalorder %s1763_s27, 0  ;;  %p45_p1 = scmp.ne.s32.totalorder %s1276_s14, %s1272_s13 }
  0x26   : > { %p46_p4 = scmp.eq.s32.totalorder %s1288_s17, 0  ;;  %p1122_p5 = scmp.lt.s32.totalorder %s1288_s17, 2 }
  0x27   : > { %s1775_s25 = smov (%p1764_p9, %s29_s25), 0  ;;  %s159_s12 = sand.u32 1, %s1276_s14  }
  0x28   : > { %s33_s11 = ssub.s32 %s1284_s16, %s1775_s25  ;;  %p47_p10 = por %p46_p4, %p45_p1 }
  0x29   : > { %p36_p8 = scmp.eq.s32.totalorder %s33_s11, 0  ;;  %s1020_s18 = sshll.u32 %s1284_s16, 7 }
  0x2a   : > { %s944_s24 = sshll.u32 %s159_s12, 3  ;;  %s1409_s23 = scalar_lea.hbm %s1751_s0, %s1020_s18 }
  0x2b   : > { %s1404_s22 = scalar_select %p36_p8, %s1276_s14, %s38_s26  }
  0x2c   : > { %s163_s27 = scalar_lea.vmem [#allocation2], %s944_s24  ;;  %p1411_p7 = pnand %p1122_p5, %p47_p10 }
  0x2d   : > { %s173_s30 = sshll.u32 %s163_s27, 4  ;;  %s160_s26 = scalar_lea.sflag [#allocation3], %s159_s12  ;;  %s1415_s30 = int_to_ptr.vmem [resolvable:$true] %s173_s30 }
  0x2e   : > { %s1204_s5 = scalar_lea.hbm %s1409_s23, 128  ;;  %p1206_p12 = pneg %p1411_p7 }
  0x2f   : > { %p1205_p11 = scmp.ne.s32.totalorder %s1409_s23, %s1204_s5  ;;  %s1209_s8 = scalar_lea.hbm %s1751_s0, 256 }
  0x30   : > { %p1210_p2 = scmp.lt.u32.totalorder %s1409_s23, %s1751_s0  ;;  %p1211_p3 = scmp.lt.u32.totalorder %s1209_s8, %s1204_s5 }
  0x31   : > { %p1207_p13 = pnand %p1206_p12, %p1205_p11  ;;  %p1213_p9 = scmp.lt.u32.totalorder %s1204_s5, %s1409_s23 }
  0x32   : > { %p1212_p6 = por %p1211_p3, %p1210_p2 }
  0x33   : > { %p1208_p0 = pneg %p1207_p13 }
  0x34   : > { %p1214_p1 = por %p1213_p9, %p1212_p6 }
  0x36   : > { %p1215_p4 = pnand %p1214_p1, %p1208_p0 }
  0x38   : > { %1218 = shalt.err (!%p1215_p4)
}
  0x39   : > { %s1219_s11 = scalar_lea.vmem %s1415_s30, 128  ;;  %s1291_s12 = smov [#allocation2]  }
  0x3a   : > { %p1220_p5 = scmp.ne.s32.totalorder %s1415_s30, %s1219_s11  ;;  %s1224_s18 = sshll.u32 %s1291_s12, 4  ;;  %s1225_s18 = int_to_ptr.vmem [resolvable:$false] %s1224_s18 }
  0x3b   : > { %s1226_s24 = scalar_lea.vmem %s1225_s18, 256  ;;  %p1227_p11 = scmp.lt.s32.totalorder %s1415_s30, %s1225_s18 }
  0x3c   : > { %p1222_p8 = pnand %p1220_p5, %p1206_p12  ;;  %p1228_p13 = scmp.lt.s32.totalorder %s1226_s24, %s1219_s11 }
  0x3e   : > { %p1223_p10 = pneg %p1222_p8  ;;  %p1229_p2 = por %p1228_p13, %p1227_p11 }
  0x40   : > { %p1230_p3 = pnand %p1229_p2, %p1223_p10 }
  0x42   : > { %1233 = shalt.err (!%p1230_p3)
}
  0x43   : > { %1120 = dma.hbm_to_vmem [thread:$0]  (!%p1411_p7), %s1409_s23, 128, %s1415_s30, %s160_s26  }
  0x44   : > { %p1766_p0 = scmp.ne.s32.totalorder %s1761_s21, 0 }
  0x45   : > { %s184_s28 = sand.u32 (!%p1766_p0), 1, %s1272_s13   ;;  %p1767_p12 = scmp.ne.s32.totalorder (!%p1766_p0), %s1760_s20, 0 }
  0x46   : > { %182 = sbr.rel (%p1766_p0) target bundleno = 722 (0x2d2), region = 32  ;;  %s948_s29 = sshll.u32 (!%p1766_p0), %s184_s28, 3 }
  0x47   : > { %s185_s27 = scalar_lea.sflag (!%p1766_p0), [#allocation3], %s184_s28  ;;  %s188_s5 = scalar_lea.vmem (!%p1766_p0), [#allocation2], %s948_s29 }
  0x4d   : > { %1259 = dma.done.wait (%p1767_p12), %s185_s27, 128  }
  0x4e   : > { %1261 = vsyncadd (%p1767_p12), %s185_s27, 4294967168  ;;  %p1768_p6 = scmp.ne.s32.totalorder %s1759_s19, 0 }
  0x50   : > { %1263 = dma.done.wait (%p1768_p6), [#allocation5], 64  }
  0x51   : > { %1265 = vsyncadd (%p1768_p6), [#allocation5], 4294967232  ;;  %v232_v0 = vld [vmem:[%s188_s5] sm:$0xff]  ;;  %v233_v1 = vld [vmem:[#allocation4] sm:$0xf]  ;;  %vm405_vm0 = vcmask 1043456  }
  0x52   : > { %244 = vxpose.xlu0.b32.start.end [1/1] (short) %v232_v0, 128  ;;  %1055 = vmatprep.subr.msk.mxu0 %vm405_vm0, %v233_v1  ;;  %v242_v2 = vcombine.high %v232_v0, %v232_v0  ;;  %vm308_vm1 = vcmask 31744   ;;  %p222_p7 = scmp.lt.s32.totalorder %s1280_s15, 1  ;;  %v1490_v35 = vld [vmem:[%s1753_s2] ss:$0 sm:$0xff]  ;;  %vm634_vm2 = vcmask 64512  }
  0x53   : > { %1105 = vmatprep.subr.msk.mxu1 %vm405_vm0, %v233_v1  ;;  %1056 = vmatpush3.msk.msra.mxu0 %vm405_vm0, %v233_v1 }
  0x54   : > { %1106 = vmatpush3.msk.msra.mxu1 %vm405_vm0, %v233_v1  ;;  %s1777_s15 = smov (!%p222_p7, %s1280_s15), 1 }
  0x55   : > { %s1021_s19 = sshll.u32 %s1777_s15, 9  ;;  %s1292_s15 = smov 120  }
  0x56   : > { %s1495_s4 = scalar_lea.vmem %s1754_s3, %s1021_s19 }
  0x8f   : > { %276 = vxpose.xlu0.b32.start.end [1/1] (short) %v242_v2, 128 }
  0xd2   : > { %v260_v3 = vpop.trf.xlu0 }
  0xd3   : > { %1057 = vmatprep.mubr.msk.f32.mxu0 %vm308_vm1, %v260_v3 }
  0xd6   : > { %v261_v4 = vpop.trf.xlu0 }
  0xd7   : > { %1058 = vmatmul.mubr.msk.f32.vlgmr.msra.gmra.mrb[0].mxu0 %vm308_vm1, %v261_v4 }
  0xda   : > { %v262_v5 = vpop.trf.xlu0 }
  0xdb   : > { %1060 = vmatprep.mubr.msk.f32.mxu0 %vm308_vm1, %v262_v5 }
  0xde   : > { %v263_v6 = vpop.trf.xlu0 }
  0xdf   : > { %1061 = vmatmul.mubr.msk.f32.gmra.mrb[2].mxu0 %vm308_vm1, %v263_v6 }
  0xe2   : > { %v264_v7 = vpop.trf.xlu0 }
  0xe3   : > { %1063 = vmatprep.mubr.msk.f32.mxu0 %vm308_vm1, %v264_v7 }
  0xe6   : > { %v265_v8 = vpop.trf.xlu0 }
  0xe7   : > { %1064 = vmatmul.mubr.msk.f32.gmra.mrb[4].mxu0 %vm308_vm1, %v265_v8 }
  0xea   : > { %v266_v9 = vpop.trf.xlu0 }
  0xeb   : > { %1066 = vmatprep.mubr.msk.f32.mxu0 %vm308_vm1, %v266_v9 }
  0xee   : > { %v267_v10 = vpop.trf.xlu0 }
  0xef   : > { %1067 = vmatmul.mubr.msk.f32.gmra.mrb[6].mxu0 %vm308_vm1, %v267_v10 }
  0xf2   : > { %v268_v11 = vpop.trf.xlu0 }
  0xf3   : > { %1069 = vmatprep.mubr.msk.f32.mxu0 %vm308_vm1, %v268_v11 }
  0xf6   : > { %v269_v12 = vpop.trf.xlu0 }
  0xf7   : > { %1070 = vmatmul.mubr.msk.f32.gmra.mrb[8].mxu0 %vm308_vm1, %v269_v12 }
  0xfa   : > { %v270_v13 = vpop.trf.xlu0 }
  0xfb   : > { %1072 = vmatprep.mubr.msk.f32.mxu0 %vm308_vm1, %v270_v13 }
  0xfe   : > { %v271_v14 = vpop.trf.xlu0 }
  0xff   : > { %1073 = vmatmul.mubr.msk.f32.gmra.mrb[10].mxu0 %vm308_vm1, %v271_v14 }
 0x102   : > { %v272_v15 = vpop.trf.xlu0 }
 0x103   : > { %1075 = vmatprep.mubr.msk.f32.mxu0 %vm308_vm1, %v272_v15 }
 0x106   : > { %v273_v16 = vpop.trf.xlu0 }
 0x107   : > { %1076 = vmatmul.mubr.msk.f32.gmra.mrb[12].mxu0 %vm308_vm1, %v273_v16 }
 0x10a   : > { %v274_v17 = vpop.trf.xlu0 }
 0x10b   : > { %1078 = vmatprep.mubr.msk.f32.mxu0 %vm308_vm1, %v274_v17 }
 0x10e   : > { %v275_v18 = vpop.trf.xlu0 }
 0x10f   : > { %1079 = vmatmul.mubr.msk.f32.gmra.mrb[14].mxu0 %vm308_vm1, %v275_v18 }
 0x112   : > { %v292_v19 = vpop.trf.xlu0 }
 0x113   : > { %1081 = vmatprep.mubr.msk.f32.mxu1 %vm308_vm1, %v292_v19 }
 0x116   : > { %v293_v20 = vpop.trf.xlu0 }
 0x117   : > { %1082 = vmatmul.mubr.msk.f32.vlgmr.msra.gmra.mrb[0].mxu1 %vm308_vm1, %v293_v20 }
 0x11a   : > { %v294_v21 = vpop.trf.xlu0 }
 0x11b   : > { %1084 = vmatprep.mubr.msk.f32.mxu1 %vm308_vm1, %v294_v21 }
 0x11e   : > { %v295_v22 = vpop.trf.xlu0 }
 0x11f   : > { %1085 = vmatmul.mubr.msk.f32.gmra.mrb[2].mxu1 %vm308_vm1, %v295_v22 }
 0x122   : > { %v296_v23 = vpop.trf.xlu0 }
 0x123   : > { %1087 = vmatprep.mubr.msk.f32.mxu1 %vm308_vm1, %v296_v23 }
 0x126   : > { %v297_v24 = vpop.trf.xlu0 }
 0x127   : > { %1088 = vmatmul.mubr.msk.f32.gmra.mrb[4].mxu1 %vm308_vm1, %v297_v24 }
 0x12a   : > { %v298_v25 = vpop.trf.xlu0 }
 0x12b   : > { %1090 = vmatprep.mubr.msk.f32.mxu1 %vm308_vm1, %v298_v25 }
 0x12e   : > { %v299_v26 = vpop.trf.xlu0 }
 0x12f   : > { %1091 = vmatmul.mubr.msk.f32.gmra.mrb[6].mxu1 %vm308_vm1, %v299_v26 }
 0x132   : > { %v300_v27 = vpop.trf.xlu0 }
 0x133   : > { %1093 = vmatprep.mubr.msk.f32.mxu1 %vm308_vm1, %v300_v27 }
 0x136   : > { %v301_v28 = vpop.trf.xlu0 }
 0x137   : > { %1094 = vmatmul.mubr.msk.f32.gmra.mrb[8].mxu1 %vm308_vm1, %v301_v28 }
 0x13a   : > { %v302_v29 = vpop.trf.xlu0 }
 0x13b   : > { %1096 = vmatprep.mubr.msk.f32.mxu1 %vm308_vm1, %v302_v29 }
 0x13e   : > { %v303_v30 = vpop.trf.xlu0 }
 0x13f   : > { %1097 = vmatmul.mubr.msk.f32.gmra.mrb[10].mxu1 %vm308_vm1, %v303_v30 }
 0x142   : > { %v304_v31 = vpop.trf.xlu0 }
 0x143   : > { %1099 = vmatprep.mubr.msk.f32.mxu1 %vm308_vm1, %v304_v31 }
 0x146   : > { %v305_v32 = vpop.trf.xlu0 }
 0x147   : > { %1100 = vmatmul.mubr.msk.f32.gmra.mrb[12].mxu1 %vm308_vm1, %v305_v32 }
 0x14a   : > { %v306_v33 = vpop.trf.xlu0 }
 0x14b   : > { %1102 = vmatprep.mubr.msk.f32.mxu1 %vm308_vm1, %v306_v33 }
 0x14e   : > { %v307_v34 = vpop.trf.xlu0 }
 0x14f   : > { %1103 = vmatmul.mubr.msk.f32.gmra.mrb[14].mxu1 %vm308_vm1, %v307_v34 }
 0x1aa   : > { %v1059_v36 = vpop.f32.mrb[0].mxu0 }
 0x1ab   : > { %v481_v37 = vadd.f32 %v1059_v36, %v1490_v35  ;;  %v475_v38 = vpop.f32.mrb[1].mxu0 }
 0x1ac   : > { %v476_v39 = vadd.f32 %v1490_v35, %v475_v38 }
 0x1ad   : > { %636 = vst.msk [vmem:[%s1495_s4 + $0x8] sm:$0xff] %vm634_vm2, %v481_v37  ;;  %701 = vrot.lane.b32.xlu1 %v481_v37, %s1292_s15 }
 0x1ae   : > { %635 = vst.msk [vmem:[%s1495_s4] sm:$0xff] %vm634_vm2, %v476_v39 }
 0x1b1   : > { %699 = vrot.lane.b32.xlu1 %v476_v39, %s1292_s15 }
 0x1b2   : > { %v1062_v40 = vpop.f32.mrb[2].mxu0 }
 0x1b3   : > { %v491_v41 = vadd.f32 %v1062_v40, %v1490_v35  ;;  %v485_v42 = vpop.f32.mrb[3].mxu0 }
 0x1b4   : > { %v486_v43 = vadd.f32 %v1490_v35, %v485_v42 }
 0x1b5   : > { %638 = vst.msk [vmem:[%s1495_s4 + $0x28] sm:$0xff] %vm634_vm2, %v491_v41 }
 0x1b6   : > { %637 = vst.msk [vmem:[%s1495_s4 + $0x20] sm:$0xff] %vm634_vm2, %v486_v43 }
 0x1ba   : > { %v1065_v44 = vpop.f32.mrb[4].mxu0 }
 0x1bb   : > { %v501_v45 = vadd.f32 %v1065_v44, %v1490_v35  ;;  %v495_v46 = vpop.f32.mrb[5].mxu0 }
 0x1bc   : > { %v1513_v47 = vadd.f32 %v1490_v35, %v495_v46 }
 0x1bd   : > { %640 = vst.msk [vmem:[%s1495_s4 + $0x48] sm:$0xff] %vm634_vm2, %v501_v45 }
 0x1be   : > { %639 = vst.msk [vmem:[%s1495_s4 + $0x40] sm:$0xff] %vm634_vm2, %v1513_v47 }
 0x1c2   : > { %v1068_v48 = vpop.f32.mrb[6].mxu0 }
 0x1c3   : > { %v1521_v49 = vadd.f32 %v1068_v48, %v1490_v35  ;;  %v505_v50 = vpop.f32.mrb[7].mxu0 }
 0x1c4   : > { %v1524_v51 = vadd.f32 %v1490_v35, %v505_v50 }
 0x1c5   : > { %642 = vst.msk [vmem:[%s1495_s4 + $0x68] sm:$0xff] %vm634_vm2, %v1521_v49 }
 0x1c6   : > { %641 = vst.msk [vmem:[%s1495_s4 + $0x60] sm:$0xff] %vm634_vm2, %v1524_v51 }
 0x1ca   : > { %v1071_v52 = vpop.f32.mrb[8].mxu0 }
 0x1cb   : > { %v1533_v53 = vadd.f32 %v1071_v52, %v1490_v35  ;;  %v515_v54 = vpop.f32.mrb[9].mxu0 }
 0x1cc   : > { %v1536_v55 = vadd.f32 %v1490_v35, %v515_v54 }
 0x1cd   : > { %644 = vst.msk [vmem:[%s1495_s4 + $0x88] sm:$0xff] %vm634_vm2, %v1533_v53 }
 0x1ce   : > { %643 = vst.msk [vmem:[%s1495_s4 + $0x80] sm:$0xff] %vm634_vm2, %v1536_v55 }
 0x1d2   : > { %v1074_v56 = vpop.f32.mrb[10].mxu0 }
 0x1d3   : > { %v1545_v57 = vadd.f32 %v1074_v56, %v1490_v35  ;;  %v525_v58 = vpop.f32.mrb[11].mxu0 }
 0x1d4   : > { %v1548_v59 = vadd.f32 %v1490_v35, %v525_v58 }
 0x1d5   : > { %646 = vst.msk [vmem:[%s1495_s4 + $0xa8] sm:$0xff] %vm634_vm2, %v1545_v57 }
 0x1d6   : > { %645 = vst.msk [vmem:[%s1495_s4 + $0xa0] sm:$0xff] %vm634_vm2, %v1548_v59 }
 0x1da   : > { %v1077_v60 = vpop.f32.mrb[12].mxu0 }
 0x1db   : > { %v1557_v61 = vadd.f32 %v1077_v60, %v1490_v35  ;;  %v535_v62 = vpop.f32.mrb[13].mxu0 }
 0x1dc   : > { %v1560_v63 = vadd.f32 %v1490_v35, %v535_v62 }
 0x1dd   : > { %648 = vst.msk [vmem:[%s1495_s4 + $0xc8] sm:$0xff] %vm634_vm2, %v1557_v61 }
 0x1de   : > { %647 = vst.msk [vmem:[%s1495_s4 + $0xc0] sm:$0xff] %vm634_vm2, %v1560_v63 }
 0x1e2   : > { %v1080_v0 = vpop.f32.mrb[14].mxu0 }
 0x1e3   : > { %v1569_v1 = vadd.f32 %v1080_v0, %v1490_v35  ;;  %v545_v2 = vpop.f32.mrb[15].mxu0 }
 0x1e4   : > { %v1572_v3 = vadd.f32 %v1490_v35, %v545_v2 }
 0x1e5   : > { %650 = vst.msk [vmem:[%s1495_s4 + $0xe8] sm:$0xff] %vm634_vm2, %v1569_v1 }
 0x1e6   : > { %649 = vst.msk [vmem:[%s1495_s4 + $0xe0] sm:$0xff] %vm634_vm2, %v1572_v3 }
 0x1ea   : > { %v1083_v4 = vpop.f32.mrb[0].mxu1 }
 0x1eb   : > { %v561_v5 = vadd.f32 %v1083_v4, %v1490_v35  ;;  %v555_v6 = vpop.f32.mrb[1].mxu1 }
 0x1ec   : > { %v556_v7 = vadd.f32 %v1490_v35, %v555_v6 }
 0x1ed   : > { %652 = vst.msk [vmem:[%s1495_s4 + $0x108] sm:$0xff] %vm634_vm2, %v561_v5  ;;  %733 = vrot.lane.b32.xlu0 %v561_v5, %s1292_s15 }
 0x1ee   : > { %651 = vst.msk [vmem:[%s1495_s4 + $0x100] sm:$0xff] %vm634_vm2, %v556_v7  ;;  %731 = vrot.lane.b32.xlu1 %v556_v7, %s1292_s15 }
 0x1f2   : > { %705 = vrot.lane.b32.xlu1 %v491_v41, %s1292_s15  ;;  %v1086_v8 = vpop.f32.mrb[2].mxu1 }
 0x1f3   : > { %v571_v9 = vadd.f32 %v1086_v8, %v1490_v35  ;;  %v565_v10 = vpop.f32.mrb[3].mxu1 }
 0x1f4   : > { %v566_v11 = vadd.f32 %v1490_v35, %v565_v10 }
 0x1f5   : > { %654 = vst.msk [vmem:[%s1495_s4 + $0x128] sm:$0xff] %vm634_vm2, %v571_v9 }
 0x1f6   : > { %703 = vrot.lane.b32.xlu1 %v486_v43, %s1292_s15  ;;  %653 = vst.msk [vmem:[%s1495_s4 + $0x120] sm:$0xff] %vm634_vm2, %v566_v11 }
 0x1fa   : > { %737 = vrot.lane.b32.xlu1 %v571_v9, %s1292_s15  ;;  %v1089_v12 = vpop.f32.mrb[4].mxu1 }
 0x1fb   : > { %v581_v13 = vadd.f32 %v1089_v12, %v1490_v35  ;;  %v575_v14 = vpop.f32.mrb[5].mxu1 }
 0x1fc   : > { %v576_v15 = vadd.f32 %v1490_v35, %v575_v14 }
 0x1fd   : > { %656 = vst.msk [vmem:[%s1495_s4 + $0x148] sm:$0xff] %vm634_vm2, %v581_v13 }
 0x1fe   : > { %735 = vrot.lane.b32.xlu1 %v566_v11, %s1292_s15  ;;  %655 = vst.msk [vmem:[%s1495_s4 + $0x140] sm:$0xff] %vm634_vm2, %v576_v15 }
 0x202   : > { %709 = vrot.lane.b32.xlu1 %v501_v45, %s1292_s15  ;;  %v1092_v16 = vpop.f32.mrb[6].mxu1 }
 0x203   : > { %v591_v17 = vadd.f32 %v1092_v16, %v1490_v35  ;;  %v585_v18 = vpop.f32.mrb[7].mxu1 }
 0x204   : > { %v586_v19 = vadd.f32 %v1490_v35, %v585_v18 }
 0x205   : > { %658 = vst.msk [vmem:[%s1495_s4 + $0x168] sm:$0xff] %vm634_vm2, %v591_v17 }
 0x206   : > { %707 = vrot.lane.b32.xlu1 %v1513_v47, %s1292_s15  ;;  %657 = vst.msk [vmem:[%s1495_s4 + $0x160] sm:$0xff] %vm634_vm2, %v586_v19 }
 0x20a   : > { %741 = vrot.lane.b32.xlu1 %v581_v13, %s1292_s15  ;;  %v1095_v20 = vpop.f32.mrb[8].mxu1 }
 0x20b   : > { %v601_v21 = vadd.f32 %v1095_v20, %v1490_v35  ;;  %v595_v22 = vpop.f32.mrb[9].mxu1 }
 0x20c   : > { %v596_v23 = vadd.f32 %v1490_v35, %v595_v22 }
 0x20d   : > { %660 = vst.msk [vmem:[%s1495_s4 + $0x188] sm:$0xff] %vm634_vm2, %v601_v21 }
 0x20e   : > { %739 = vrot.lane.b32.xlu1 %v576_v15, %s1292_s15  ;;  %659 = vst.msk [vmem:[%s1495_s4 + $0x180] sm:$0xff] %vm634_vm2, %v596_v23 }
 0x212   : > { %713 = vrot.lane.b32.xlu1 %v1521_v49, %s1292_s15  ;;  %v1098_v24 = vpop.f32.mrb[10].mxu1 }
 0x213   : > { %v611_v25 = vadd.f32 %v1098_v24, %v1490_v35  ;;  %v605_v26 = vpop.f32.mrb[11].mxu1 }
 0x214   : > { %v606_v27 = vadd.f32 %v1490_v35, %v605_v26 }
 0x215   : > { %662 = vst.msk [vmem:[%s1495_s4 + $0x1a8] sm:$0xff] %vm634_vm2, %v611_v25 }
 0x216   : > { %711 = vrot.lane.b32.xlu1 %v1524_v51, %s1292_s15  ;;  %661 = vst.msk [vmem:[%s1495_s4 + $0x1a0] sm:$0xff] %vm634_vm2, %v606_v27 }
 0x21a   : > { %745 = vrot.lane.b32.xlu1 %v591_v17, %s1292_s15  ;;  %v1101_v28 = vpop.f32.mrb[12].mxu1 }
 0x21b   : > { %v621_v29 = vadd.f32 %v1101_v28, %v1490_v35  ;;  %v615_v30 = vpop.f32.mrb[13].mxu1 }
 0x21c   : > { %v616_v31 = vadd.f32 %v1490_v35, %v615_v30 }
 0x21d   : > { %664 = vst.msk [vmem:[%s1495_s4 + $0x1c8] sm:$0xff] %vm634_vm2, %v621_v29 }
 0x21e   : > { %743 = vrot.lane.b32.xlu1 %v586_v19, %s1292_s15  ;;  %663 = vst.msk [vmem:[%s1495_s4 + $0x1c0] sm:$0xff] %vm634_vm2, %v616_v31 }
 0x21f   : > { %v702_v32 = vpop.permute.xlu1 %701 }
 0x220   : > { %987 = vst.msk [vmem:[%s1495_s4 + $0x18] sm:$0xff] %vm634_vm2, %v702_v32 }
 0x222   : > { %717 = vrot.lane.b32.xlu1 %v1533_v53, %s1292_s15  ;;  %v1104_v33 = vpop.f32.mrb[14].mxu1 }
 0x223   : > { %v700_v34 = vpop.permute.xlu1 %699  ;;  %v631_v36 = vadd.f32 %v1104_v33, %v1490_v35  ;;  %v625_v37 = vpop.f32.mrb[15].mxu1 }
 0x224   : > { %986 = vst.msk [vmem:[%s1495_s4 + $0x10] sm:$0xff] %vm634_vm2, %v700_v34  ;;  %v626_v38 = vadd.f32 %v1490_v35, %v625_v37 }
 0x225   : > { %666 = vst.msk [vmem:[%s1495_s4 + $0x1e8] sm:$0xff] %vm634_vm2, %v631_v36 }
 0x226   : > { %715 = vrot.lane.b32.xlu1 %v1536_v55, %s1292_s15  ;;  %665 = vst.msk [vmem:[%s1495_s4 + $0x1e0] sm:$0xff] %vm634_vm2, %v626_v38 }
 0x22a   : > { %749 = vrot.lane.b32.xlu1 %v601_v21, %s1292_s15 }
 0x22e   : > { %747 = vrot.lane.b32.xlu1 %v596_v23, %s1292_s15 }
 0x232   : > { %721 = vrot.lane.b32.xlu1 %v1545_v57, %s1292_s15 }
 0x236   : > { %719 = vrot.lane.b32.xlu1 %v1548_v59, %s1292_s15 }
 0x23a   : > { %753 = vrot.lane.b32.xlu1 %v611_v25, %s1292_s15 }
 0x23e   : > { %751 = vrot.lane.b32.xlu1 %v606_v27, %s1292_s15 }
 0x242   : > { %725 = vrot.lane.b32.xlu1 %v1557_v61, %s1292_s15 }
 0x246   : > { %723 = vrot.lane.b32.xlu1 %v1560_v63, %s1292_s15 }
 0x24a   : > { %757 = vrot.lane.b32.xlu1 %v621_v29, %s1292_s15 }
 0x24e   : > { %755 = vrot.lane.b32.xlu1 %v616_v31, %s1292_s15 }
 0x252   : > { %729 = vrot.lane.b32.xlu1 %v1569_v1, %s1292_s15 }
 0x256   : > { %727 = vrot.lane.b32.xlu1 %v1572_v3, %s1292_s15 }
 0x25a   : > { %759 = vrot.lane.b32.xlu1 %v626_v38, %s1292_s15 }
 0x25e   : > { %761 = vrot.lane.b32.xlu1 %v631_v36, %s1292_s15 }
 0x25f   : > { %v734_v35 = vpop.permute.xlu0 %733 }
 0x260   : > { %1003 = vst.msk [vmem:[%s1495_s4 + $0x118] sm:$0xff] %vm634_vm2, %v734_v35  ;;  %v732_v39 = vpop.permute.xlu1 %731 }
 0x261   : > { %1002 = vst.msk [vmem:[%s1495_s4 + $0x110] sm:$0xff] %vm634_vm2, %v732_v39 }
 0x264   : > { %v706_v40 = vpop.permute.xlu1 %705 }
 0x265   : > { %989 = vst.msk [vmem:[%s1495_s4 + $0x38] sm:$0xff] %vm634_vm2, %v706_v40 }
 0x268   : > { %v704_v41 = vpop.permute.xlu1 %703 }
 0x269   : > { %988 = vst.msk [vmem:[%s1495_s4 + $0x30] sm:$0xff] %vm634_vm2, %v704_v41 }
 0x26c   : > { %v738_v42 = vpop.permute.xlu1 %737 }
 0x26d   : > { %1005 = vst.msk [vmem:[%s1495_s4 + $0x138] sm:$0xff] %vm634_vm2, %v738_v42 }
 0x270   : > { %v736_v43 = vpop.permute.xlu1 %735 }
 0x271   : > { %1004 = vst.msk [vmem:[%s1495_s4 + $0x130] sm:$0xff] %vm634_vm2, %v736_v43 }
 0x274   : > { %v710_v44 = vpop.permute.xlu1 %709 }
 0x275   : > { %991 = vst.msk [vmem:[%s1495_s4 + $0x58] sm:$0xff] %vm634_vm2, %v710_v44 }
 0x278   : > { %v708_v45 = vpop.permute.xlu1 %707 }
 0x279   : > { %990 = vst.msk [vmem:[%s1495_s4 + $0x50] sm:$0xff] %vm634_vm2, %v708_v45 }
 0x27c   : > { %v742_v46 = vpop.permute.xlu1 %741 }
 0x27d   : > { %1007 = vst.msk [vmem:[%s1495_s4 + $0x158] sm:$0xff] %vm634_vm2, %v742_v46 }
 0x280   : > { %v740_v47 = vpop.permute.xlu1 %739 }
 0x281   : > { %1006 = vst.msk [vmem:[%s1495_s4 + $0x150] sm:$0xff] %vm634_vm2, %v740_v47 }
 0x284   : > { %v714_v48 = vpop.permute.xlu1 %713 }
 0x285   : > { %993 = vst.msk [vmem:[%s1495_s4 + $0x78] sm:$0xff] %vm634_vm2, %v714_v48 }
 0x288   : > { %v712_v49 = vpop.permute.xlu1 %711 }
 0x289   : > { %992 = vst.msk [vmem:[%s1495_s4 + $0x70] sm:$0xff] %vm634_vm2, %v712_v49 }
 0x28c   : > { %v746_v50 = vpop.permute.xlu1 %745 }
 0x28d   : > { %1009 = vst.msk [vmem:[%s1495_s4 + $0x178] sm:$0xff] %vm634_vm2, %v746_v50 }
 0x290   : > { %v744_v51 = vpop.permute.xlu1 %743 }
 0x291   : > { %1008 = vst.msk [vmem:[%s1495_s4 + $0x170] sm:$0xff] %vm634_vm2, %v744_v51 }
 0x294   : > { %v718_v52 = vpop.permute.xlu1 %717 }
 0x295   : > { %995 = vst.msk [vmem:[%s1495_s4 + $0x98] sm:$0xff] %vm634_vm2, %v718_v52 }
 0x298   : > { %v716_v53 = vpop.permute.xlu1 %715 }
 0x299   : > { %994 = vst.msk [vmem:[%s1495_s4 + $0x90] sm:$0xff] %vm634_vm2, %v716_v53 }
 0x29c   : > { %v750_v54 = vpop.permute.xlu1 %749 }
 0x29d   : > { %1011 = vst.msk [vmem:[%s1495_s4 + $0x198] sm:$0xff] %vm634_vm2, %v750_v54 }
 0x2a0   : > { %v748_v55 = vpop.permute.xlu1 %747 }
 0x2a1   : > { %1010 = vst.msk [vmem:[%s1495_s4 + $0x190] sm:$0xff] %vm634_vm2, %v748_v55 }
 0x2a4   : > { %v722_v56 = vpop.permute.xlu1 %721 }
 0x2a5   : > { %997 = vst.msk [vmem:[%s1495_s4 + $0xb8] sm:$0xff] %vm634_vm2, %v722_v56 }
 0x2a8   : > { %v720_v57 = vpop.permute.xlu1 %719 }
 0x2a9   : > { %996 = vst.msk [vmem:[%s1495_s4 + $0xb0] sm:$0xff] %vm634_vm2, %v720_v57 }
 0x2ac   : > { %v754_v58 = vpop.permute.xlu1 %753 }
 0x2ad   : > { %1013 = vst.msk [vmem:[%s1495_s4 + $0x1b8] sm:$0xff] %vm634_vm2, %v754_v58 }
 0x2b0   : > { %v752_v59 = vpop.permute.xlu1 %751 }
 0x2b1   : > { %1012 = vst.msk [vmem:[%s1495_s4 + $0x1b0] sm:$0xff] %vm634_vm2, %v752_v59 }
 0x2b4   : > { %v726_v60 = vpop.permute.xlu1 %725 }
 0x2b5   : > { %999 = vst.msk [vmem:[%s1495_s4 + $0xd8] sm:$0xff] %vm634_vm2, %v726_v60 }
 0x2b8   : > { %v724_v61 = vpop.permute.xlu1 %723 }
 0x2b9   : > { %998 = vst.msk [vmem:[%s1495_s4 + $0xd0] sm:$0xff] %vm634_vm2, %v724_v61 }
 0x2bc   : > { %v758_v62 = vpop.permute.xlu1 %757 }
 0x2bd   : > { %1015 = vst.msk [vmem:[%s1495_s4 + $0x1d8] sm:$0xff] %vm634_vm2, %v758_v62 }
 0x2c0   : > { %v756_v63 = vpop.permute.xlu1 %755 }
 0x2c1   : > { %1014 = vst.msk [vmem:[%s1495_s4 + $0x1d0] sm:$0xff] %vm634_vm2, %v756_v63 }
 0x2c4   : > { %v730_v0 = vpop.permute.xlu1 %729 }
 0x2c5   : > { %1001 = vst.msk [vmem:[%s1495_s4 + $0xf8] sm:$0xff] %vm634_vm2, %v730_v0 }
 0x2c8   : > { %v728_v1 = vpop.permute.xlu1 %727 }
 0x2c9   : > { %1000 = vst.msk [vmem:[%s1495_s4 + $0xf0] sm:$0xff] %vm634_vm2, %v728_v1 }
 0x2cc   : > { %v760_v2 = vpop.permute.xlu1 %759 }
 0x2cd   : > { %1016 = vst.msk [vmem:[%s1495_s4 + $0x1f0] sm:$0xff] %vm634_vm2, %v760_v2 }
 0x2d0   : > { %v762_v3 = vpop.permute.xlu1 %761 }
 0x2d1   : > { %1017 = vst.msk [vmem:[%s1495_s4 + $0x1f8] sm:$0xff] %vm634_vm2, %v762_v3 }
 0x2d2 PF: > { %s17_s17 = sadd.s32 1, %s1288_s17   ;;  %s1769_s12 = smov %s1272_s13 }
 0x2d3   : > { %p14_p9 = scmp.ge.s32.totalorder %s17_s17, 4   ;;  %s1770_s13 = smov %s1276_s14 }
 0x2d4   : > { %s1771_s14 = smov %s1404_s22  ;;  %s1772_s15 = smov %s1284_s16 }
 0x2d5   : > { %s1773_s16 = smov %s1775_s25  ;;  %16 = sbr.rel (!%p14_p9) target bundleno = 5 (0x5), region = 77 }
 0x2dc   :  { %860 = vsyncpa [#allocation3], 1 }
 0x2dd   :  { %862 = vsyncpa [#allocation3 + $0x1], 1 }
 0x2de   :  { %863 = vsyncpa [#allocation5], 1 }

</bundles_post_ra>
